<compile_context>
chip_gen: v5e
topology: v5e:2x2
jax: 0.10.0
libtpu: 0.0.40
codegen_flags: <defaults>
</compile_context>

<pallas_src>
import functools

import jax
import jax.numpy as jnp
from jax.experimental import pallas as pl
from jax.experimental.pallas import tpu as pltpu

_LANE = 128  # TPU lane width; final-layer output is zero-padded up to this.


def _leaky_relu(x, slope=0.2):
    return jnp.where(x > 0, x, slope * x)


def encoder_kernel(x_ref, w1_ref, b1_ref, w2_ref, b2_ref, w3_ref, b3_ref, out_ref):
    # Fully fused 3-layer MLP in VMEM.
    # MXU path: bf16 operands, f32 accumulation (preferred_element_type).
    # VPU path: bias add + LeakyReLU in f32.
    x = x_ref[...]  # bf16, no upcast — MXU accumulates in f32 anyway.

    h1 = jnp.dot(x, w1_ref[...], preferred_element_type=jnp.float32) + b1_ref[...]
    h1 = _leaky_relu(h1)

    h2 = jnp.dot(h1.astype(jnp.bfloat16), w2_ref[...],
                 preferred_element_type=jnp.float32) + b2_ref[...]
    h2 = _leaky_relu(h2)

    h3 = jnp.dot(h2.astype(jnp.bfloat16), w3_ref[...],
                 preferred_element_type=jnp.float32) + b3_ref[...]
    out_ref[...] = h3.astype(out_ref.dtype)


@functools.partial(jax.jit, static_argnames=("block_b",))
def encoder_forward(x, w1, b1, w2, b2, w3, b3, *, block_b=512):
    """x: (B, input_size) float32. Returns (B, latent_dim) float32."""
    B, input_size = x.shape
    h1_dim = w1.shape[1]
    h2_dim = w2.shape[1]
    latent_dim = w3.shape[1]

    # Clamp the tile to the batch (block must be a multiple of 8 sublanes OR
    # equal to the full batch dim; both hold by construction here).
    block_b = min(block_b, B)
    grid = (pl.cdiv(B, block_b),)

    # Lane-dense output: zero-pad the final layer to a multiple of 128 output
    # columns so stores are full unmasked vst's; slice back afterwards.
    pad_n = (-latent_dim) % _LANE
    if pad_n:
        w3 = jnp.pad(w3, ((0, 0), (0, pad_n)))
        b3 = jnp.pad(b3, ((0, 0), (0, pad_n)))
    n_out = latent_dim + pad_n

    # bf16 matmul operands (halves the dominant HBM stream and hits the MXU's
    # native bf16 path on v5e/v6e/v7x); biases stay f32 for the VPU epilogue.
    x_bf = x.astype(jnp.bfloat16)
    w1b = w1.astype(jnp.bfloat16)
    w2b = w2.astype(jnp.bfloat16)
    w3b = w3.astype(jnp.bfloat16)
    b1f = b1.astype(jnp.float32)
    b2f = b2.astype(jnp.float32)
    b3f = b3.astype(jnp.float32)

    # Advisory cost estimate for XLA's scheduler.
    flops = 2 * B * (input_size * h1_dim + h1_dim * h2_dim + h2_dim * n_out)
    bytes_accessed = (
        B * input_size * 2                                   # x (bf16) in
        + B * n_out * 4                                      # out (f32)
        + 2 * (input_size * h1_dim + h1_dim * h2_dim + h2_dim * n_out)  # weights
        + 4 * (h1_dim + h2_dim + n_out)                      # biases
    )
    cost = pl.CostEstimate(flops=flops, transcendentals=0,
                           bytes_accessed=bytes_accessed)

    # Weights / biases are tiny; constant index maps keep them VMEM-resident
    # across the whole grid (no per-step re-DMA). Only batch is tiled.
    def _resident(arr):
        return pl.BlockSpec(arr.shape, lambda i: (0, 0))

    out = pl.pallas_call(
        encoder_kernel,
        out_shape=jax.ShapeDtypeStruct((B, n_out), jnp.float32),
        grid_spec=pltpu.PrefetchScalarGridSpec(
            num_scalar_prefetch=0,
            grid=grid,
            in_specs=[
                pl.BlockSpec((block_b, input_size), lambda i: (i, 0)),
                _resident(w1b), _resident(b1f),
                _resident(w2b), _resident(b2f),
                _resident(w3b), _resident(b3f),
            ],
            out_specs=pl.BlockSpec((block_b, n_out), lambda i: (i, 0)),
        ),
        compiler_params=pltpu.CompilerParams(
            dimension_semantics=("parallel",),
        ),
        cost_estimate=cost,
    )(x_bf, w1b, b1f, w2b, b2f, w3b, b3f)

    return out[:, :latent_dim]


def init_encoder_params(key, input_size, latent_dim):
    """Deterministic init matching the PyTorch module's parameter shapes.

    PyTorch nn.Linear weight is (out, in); we store (in, out) for y = x @ W + b.
    Uses uniform(-1/sqrt(fan_in), 1/sqrt(fan_in)) like nn.Linear's default.
    """
    dims = [(input_size, 128), (128, 64), (64, latent_dim)]
    params = []
    for (fan_in, fan_out) in dims:
        key, kw, kb = jax.random.split(key, 3)
        bound = 1.0 / jnp.sqrt(float(fan_in))
        w = jax.random.uniform(kw, (fan_in, fan_out), jnp.float32, -bound, bound)
        b = jax.random.uniform(kb, (1, fan_out), jnp.float32, -bound, bound)
        params.extend([w, b])
    return tuple(params)


def reference_forward_mixed(x, w1, b1, w2, b2, w3, b3):
    """Pure-JAX reference with the same bf16-operand / f32-accumulate numerics."""
    xb = x.astype(jnp.bfloat16)
    w1b, w2b, w3b = (w.astype(jnp.bfloat16) for w in (w1, w2, w3))
    h1 = _leaky_relu(jnp.dot(xb, w1b, preferred_element_type=jnp.float32) + b1)
    h2 = _leaky_relu(jnp.dot(h1.astype(jnp.bfloat16), w2b,
                             preferred_element_type=jnp.float32) + b2)
    return jnp.dot(h2.astype(jnp.bfloat16), w3b,
                   preferred_element_type=jnp.float32) + b3


def reference_forward_f32(x, w1, b1, w2, b2, w3, b3):
    h1 = _leaky_relu(x @ w1 + b1)
    h2 = _leaky_relu(h1 @ w2 + b2)
    return h2 @ w3 + b3


if __name__ == "__main__":
    key = jax.random.PRNGKey(0)
    batch, input_size, latent_dim = 256, 32, 16

    k_x, k_p = jax.random.split(key)
    x = jax.random.normal(k_x, (batch, input_size), jnp.float32)
    params = init_encoder_params(k_p, input_size, latent_dim)

    # block_b=128 -> grid of 2 blocks (keeps both v7x TensorCores busy while
    # staying tiny). Production callers can leave the default block_b=512.
    out = encoder_forward(x, *params, block_b=128)
    out = jax.block_until_ready(out)
    assert out.shape == (batch, latent_dim)

    # Tight check vs. an identically mixed-precision reference.
    ref_mixed = reference_forward_mixed(x, *params)
    assert jnp.allclose(out, ref_mixed, atol=2e-3, rtol=2e-3), \
        "mismatch vs mixed-precision reference"

    # Loose sanity check vs. the pure-f32 PyTorch-equivalent math.
    ref_f32 = reference_forward_f32(x, *params)
    assert jnp.allclose(out, ref_f32, atol=5e-2), "mismatch vs f32 reference"

    print("KERNEL_OK")
</pallas_src>

<mosaic_0001>
module attributes {stable_mosaic.version = 11 : i64} {
  func.func @encoder_kernel(%arg0: i32, %arg1: memref<128x32xbf16, #tpu.memory_space<vmem>>, %arg2: memref<32x128xbf16, #tpu.memory_space<vmem>>, %arg3: memref<1x128xf32, #tpu.memory_space<vmem>>, %arg4: memref<128x64xbf16, #tpu.memory_space<vmem>>, %arg5: memref<1x64xf32, #tpu.memory_space<vmem>>, %arg6: memref<64x128xbf16, #tpu.memory_space<vmem>>, %arg7: memref<1x128xf32, #tpu.memory_space<vmem>>, %arg8: memref<128x128xf32, #tpu.memory_space<vmem>>) attributes {dimension_semantics = [#tpu.dimension_semantics<parallel>], iteration_bounds = array<i64: 2>, scalar_prefetch = 0 : i64, scratch_operands = 0 : i64, tpu.core_type = #tpu.core_type<tc>, window_params = [{transform_indices = @transform_0, window_bounds = array<i64: 128, 32>}, {pipeline_mode = #tpu.pipeline_mode<synchronous>, transform_indices = @transform_1, window_bounds = array<i64: 32, 128>}, {pipeline_mode = #tpu.pipeline_mode<synchronous>, transform_indices = @transform_2, window_bounds = array<i64: 1, 128>}, {pipeline_mode = #tpu.pipeline_mode<synchronous>, transform_indices = @transform_3, window_bounds = array<i64: 128, 64>}, {pipeline_mode = #tpu.pipeline_mode<synchronous>, transform_indices = @transform_4, window_bounds = array<i64: 1, 64>}, {pipeline_mode = #tpu.pipeline_mode<synchronous>, transform_indices = @transform_5, window_bounds = array<i64: 64, 128>}, {pipeline_mode = #tpu.pipeline_mode<synchronous>, transform_indices = @transform_6, window_bounds = array<i64: 1, 128>}, {transform_indices = @transform_7, window_bounds = array<i64: 128, 128>}]} {
    %c0 = arith.constant 0 : index
    %c0_0 = arith.constant 0 : index
    %0 = vector.load %arg1[%c0, %c0_0] : memref<128x32xbf16, #tpu.memory_space<vmem>>, vector<128x32xbf16>
    %c0_1 = arith.constant 0 : index
    %c0_2 = arith.constant 0 : index
    %1 = vector.load %arg2[%c0_1, %c0_2] : memref<32x128xbf16, #tpu.memory_space<vmem>>, vector<32x128xbf16>
    %cst = arith.constant dense<0.000000e+00> : vector<128x128xf32>
    %2 = tpu.matmul %0, %1, %cst {dimension_numbers = #tpu.dot_dimension_numbers<[1], [0], [0], [1], [0, 0, 1, 1], [], []>} : vector<128x32xbf16>, vector<32x128xbf16>, vector<128x128xf32> -> vector<128x128xf32>
    %c0_3 = arith.constant 0 : index
    %c0_4 = arith.constant 0 : index
    %3 = vector.load %arg3[%c0_3, %c0_4] : memref<1x128xf32, #tpu.memory_space<vmem>>, vector<1x128xf32>
    %4 = vector.broadcast %3 : vector<1x128xf32> to vector<128x128xf32>
    %5 = arith.addf %2, %4 : vector<128x128xf32>
    %cst_5 = arith.constant 0.000000e+00 : f32
    %6 = vector.broadcast %cst_5 : f32 to vector<128x128xf32>
    %7 = arith.cmpf ogt, %5, %6 : vector<128x128xf32>
    %cst_6 = arith.constant 2.000000e-01 : f32
    %8 = vector.broadcast %cst_6 : f32 to vector<128x128xf32>
    %9 = arith.mulf %8, %5 : vector<128x128xf32>
    %10 = arith.select %7, %5, %9 : vector<128x128xi1>, vector<128x128xf32>
    %11 = arith.truncf %10 : vector<128x128xf32> to vector<128x128xbf16>
    %c0_7 = arith.constant 0 : index
    %c0_8 = arith.constant 0 : index
    %12 = vector.load %arg4[%c0_7, %c0_8] : memref<128x64xbf16, #tpu.memory_space<vmem>>, vector<128x64xbf16>
    %cst_9 = arith.constant dense<0.000000e+00> : vector<128x64xf32>
    %13 = tpu.matmul %11, %12, %cst_9 {dimension_numbers = #tpu.dot_dimension_numbers<[1], [0], [0], [1], [0, 0, 1, 1], [], []>} : vector<128x128xbf16>, vector<128x64xbf16>, vector<128x64xf32> -> vector<128x64xf32>
    %c0_10 = arith.constant 0 : index
    %c0_11 = arith.constant 0 : index
    %14 = vector.load %arg5[%c0_10, %c0_11] : memref<1x64xf32, #tpu.memory_space<vmem>>, vector<1x64xf32>
    %15 = vector.broadcast %14 : vector<1x64xf32> to vector<128x64xf32>
    %16 = arith.addf %13, %15 : vector<128x64xf32>
    %cst_12 = arith.constant 0.000000e+00 : f32
    %17 = vector.broadcast %cst_12 : f32 to vector<128x64xf32>
    %18 = arith.cmpf ogt, %16, %17 : vector<128x64xf32>
    %cst_13 = arith.constant 2.000000e-01 : f32
    %19 = vector.broadcast %cst_13 : f32 to vector<128x64xf32>
    %20 = arith.mulf %19, %16 : vector<128x64xf32>
    %21 = arith.select %18, %16, %20 : vector<128x64xi1>, vector<128x64xf32>
    %22 = arith.truncf %21 : vector<128x64xf32> to vector<128x64xbf16>
    %c0_14 = arith.constant 0 : index
    %c0_15 = arith.constant 0 : index
    %23 = vector.load %arg6[%c0_14, %c0_15] : memref<64x128xbf16, #tpu.memory_space<vmem>>, vector<64x128xbf16>
    %cst_16 = arith.constant dense<0.000000e+00> : vector<128x128xf32>
    %24 = tpu.matmul %22, %23, %cst_16 {dimension_numbers = #tpu.dot_dimension_numbers<[1], [0], [0], [1], [0, 0, 1, 1], [], []>} : vector<128x64xbf16>, vector<64x128xbf16>, vector<128x128xf32> -> vector<128x128xf32>
    %c0_17 = arith.constant 0 : index
    %c0_18 = arith.constant 0 : index
    %25 = vector.load %arg7[%c0_17, %c0_18] : memref<1x128xf32, #tpu.memory_space<vmem>>, vector<1x128xf32>
    %26 = vector.broadcast %25 : vector<1x128xf32> to vector<128x128xf32>
    %27 = arith.addf %24, %26 : vector<128x128xf32>
    %c0_19 = arith.constant 0 : index
    %c0_20 = arith.constant 0 : index
    %28 = vector.load %arg8[%c0_19, %c0_20] : memref<128x128xf32, #tpu.memory_space<vmem>>, vector<128x128xf32>
    tpu.vector_store %arg8[%c0_19, %c0_20], %27 {strides = array<i32>} : memref<128x128xf32, #tpu.memory_space<vmem>>, vector<128x128xf32>,
    return
  }
  func.func @transform_0(%arg0: i32) -> (i32, i32) {
    %c0_i32 = arith.constant 0 : i32
    %c0_i32_0 = arith.constant 0 : i32
    return %arg0, %c0_i32 : i32, i32
  }
  func.func @transform_1(%arg0: i32) -> (i32, i32) {
    %c0_i32 = arith.constant 0 : i32
    %c0_i32_0 = arith.constant 0 : i32
    %c0_i32_1 = arith.constant 0 : i32
    return %c0_i32, %c0_i32_0 : i32, i32
  }
  func.func @transform_2(%arg0: i32) -> (i32, i32) {
    %c0_i32 = arith.constant 0 : i32
    %c0_i32_0 = arith.constant 0 : i32
    %c0_i32_1 = arith.constant 0 : i32
    return %c0_i32, %c0_i32_0 : i32, i32
  }
  func.func @transform_3(%arg0: i32) -> (i32, i32) {
    %c0_i32 = arith.constant 0 : i32
    %c0_i32_0 = arith.constant 0 : i32
    %c0_i32_1 = arith.constant 0 : i32
    return %c0_i32, %c0_i32_0 : i32, i32
  }
  func.func @transform_4(%arg0: i32) -> (i32, i32) {
    %c0_i32 = arith.constant 0 : i32
    %c0_i32_0 = arith.constant 0 : i32
    %c0_i32_1 = arith.constant 0 : i32
    return %c0_i32, %c0_i32_0 : i32, i32
  }
  func.func @transform_5(%arg0: i32) -> (i32, i32) {
    %c0_i32 = arith.constant 0 : i32
    %c0_i32_0 = arith.constant 0 : i32
    %c0_i32_1 = arith.constant 0 : i32
    return %c0_i32, %c0_i32_0 : i32, i32
  }
  func.func @transform_6(%arg0: i32) -> (i32, i32) {
    %c0_i32 = arith.constant 0 : i32
    %c0_i32_0 = arith.constant 0 : i32
    %c0_i32_1 = arith.constant 0 : i32
    return %c0_i32, %c0_i32_0 : i32, i32
  }
  func.func @transform_7(%arg0: i32) -> (i32, i32) {
    %c0_i32 = arith.constant 0 : i32
    %c0_i32_0 = arith.constant 0 : i32
    return %arg0, %c0_i32 : i32, i32
  }
}

</mosaic_0001>

<bundles_post_ra>
// kernel: encoder_forward.1
= control target key start
LH: loop header
LB: loop body
LE: loop exit
PB: predicated region body
PF: predicated region fallthrough
CT: control target
= control target key end

     0   :  { %s1052_s24 = smov 0   ;;  %s1204_s0 = inlined_call_operand.vmem [shape: bf16[256,32], index: 0, kind: input, shape index: {}]   ;;  %s1205_s1 = inlined_call_operand.vmem [shape: bf16[32,128], index: 1, kind: input, shape index: {}]   ;;  %s1206_s2 = inlined_call_operand.vmem [shape: f32[1,128], index: 2, kind: input, shape index: {}]   ;;  %s1207_s3 = inlined_call_operand.vmem [shape: bf16[128,64], index: 3, kind: input, shape index: {}]   ;;  %s1208_s4 = inlined_call_operand.vmem [shape: f32[1,64], index: 4, kind: input, shape index: {}]   ;;  %s1209_s5 = inlined_call_operand.vmem [shape: bf16[64,128], index: 5, kind: input, shape index: {}]   ;;  %s1210_s6 = inlined_call_operand.vmem [shape: f32[1,128], index: 6, kind: input, shape index: {}]   ;;  %s1211_s7 = inlined_call_operand.vmem [shape: f32[256,128], index: 7, kind: output, shape index: {}]  }
   0x1 LB: > { %s844_s25 = sadd.s32 4294967295, %s1010_s24   ;;  %p848_p0 = scmp.ge.s32.totalorder %s1010_s24, 1  ;;  %s1010_s24 = sphi %s1052_s24, %s17_s24  }
   0x2   : > { %p238_p1 = scmp.lt.s32.totalorder %s1010_s24, 3 }
   0x4   : > { %p239_p2 = pnand %p848_p0, %p238_p1 }
   0x5   : > { %s849_s28 = sshll.u32 (!%p239_p2), %s844_s25, 4 }
   0x6   : > { %242 = sbr.rel (%p239_p2) target bundleno = 562 (0x232), region = 48  ;;  %p271_p3 = scmp.lt.s32.totalorder (!%p239_p2), %s849_s28, 31 }
   0xb   : > { %v968_v0 = vld [vmem:[%s1205_s1 + $0x8] sm:$0xff]  ;;  %v967_v1 = vld [vmem:[%s1205_s1] sm:$0xff]  ;;  %s1213_s28 = smov (!%p271_p3, %s849_s28), 31  ;;  %vm359_vm0 = vcmask 261120   ;;  %v976_v7 = vld [vmem:[%s1207_s3 + $0x38] sm:$0xff] }
   0xc   : > { %390 = vmatpush.bf16.msra.mxu0 %v968_v0  ;;  %s850_s8 = sshll.u32 %s1213_s28, 2  ;;  %557 = vmatpush.bf16.msra.mxu1 %v976_v7  ;;  %v975_v9 = vld [vmem:[%s1207_s3 + $0x30] sm:$0xff]  ;;  %v974_v10 = vld [vmem:[%s1207_s3 + $0x28] sm:$0xff]  ;;  %v973_v11 = vld [vmem:[%s1207_s3 + $0x20] sm:$0xff]  ;;  %s852_s19 = sshll.u32 %s1213_s28, 3 }
   0xd   : > { %s1072_s11 = scalar_lea.vmem %s1204_s0, %s850_s8  ;;  %981 = vmatpush.bf16.msra.mxu3 %v976_v7  ;;  %v972_v13 = vld [vmem:[%s1207_s3 + $0x18] sm:$0xff]  ;;  %v971_v14 = vld [vmem:[%s1207_s3 + $0x10] sm:$0xff]  ;;  %v970_v15 = vld [vmem:[%s1207_s3 + $0x8] sm:$0xff]  ;;  %s1183_s25 = scalar_lea.vmem %s1211_s7, %s852_s19 }
   0xe   : > { %v959_v2 = vld [vmem:[%s1072_s11] sm:$0xff]  ;;  %v960_v3 = vld [vmem:[%s1072_s11 + $0x8] sm:$0xff]  ;;  %v961_v4 = vld [vmem:[%s1072_s11 + $0x10] sm:$0xff] }
   0xf   : > { %v962_v5 = vld [vmem:[%s1072_s11 + $0x18] sm:$0xff]  ;;  %v963_v6 = vld [vmem:[%s1072_s11 + $0x20] sm:$0xff]  ;;  %v964_v8 = vld [vmem:[%s1072_s11 + $0x28] sm:$0xff] }
  0x10   : > { %391 = vmatpush.bf16.msra.mxu0 %v967_v1  ;;  %558 = vmatpush.bf16.msra.mxu1 %v975_v9  ;;  %v965_v12 = vld [vmem:[%s1072_s11 + $0x30] sm:$0xff]  ;;  %v969_v16 = vld [vmem:[%s1207_s3] sm:$0xff]  ;;  %v966_v17 = vld [vmem:[%s1072_s11 + $0x38] sm:$0xff] }
  0x11   : > { %982 = vmatpush.bf16.msra.mxu3 %v975_v9  ;;  %v1117_v19 = vld [vmem:[%s1206_s2] ss:$0 sm:$0xff] }
  0x13   : > { %893 = vmatmul.msk.bf16.vlgmr.msra.gmra.mxu0 %vm359_vm0, %v959_v2 }
  0x14   : > { %559 = vmatpush.bf16.msra.mxu1 %v974_v10 }
  0x15   : > { %983 = vmatpush.bf16.msra.mxu3 %v974_v10 }
  0x18   : > { %560 = vmatpush.bf16.msra.mxu1 %v973_v11 }
  0x19   : > { %984 = vmatpush.bf16.msra.mxu3 %v973_v11 }
  0x1c   : > { %561 = vmatpush.bf16.msra.mxu1 %v972_v13 }
  0x1d   : > { %985 = vmatpush.bf16.msra.mxu3 %v972_v13 }
  0x20   : > { %562 = vmatpush.bf16.msra.mxu1 %v971_v14 }
  0x21   : > { %986 = vmatpush.bf16.msra.mxu3 %v971_v14 }
  0x23   : > { %894 = vmatmul.msk.bf16.gmra.mxu0 %vm359_vm0, %v960_v3 }
  0x24   : > { %563 = vmatpush.bf16.msra.mxu1 %v970_v15 }
  0x25   : > { %987 = vmatpush.bf16.msra.mxu3 %v970_v15  ;;  %v980_v15 = vld [vmem:[%s1209_s5 + $0x18] sm:$0xff] }
  0x26   : > { %727 = vmatpush.bf16.msra.mxu2 %v980_v15 }
  0x28   : > { %564 = vmatpush.bf16.msra.mxu1 %v969_v16 }
  0x29   : > { %988 = vmatpush.bf16.msra.mxu3 %v969_v16 }
  0x2d   : > { %989 = vmatpush.bf16.msrb.mxu3 %v980_v15 }
  0x33   : > { %895 = vmatmul.msk.bf16.gmra.mxu0 %vm359_vm0, %v961_v4 }
  0x43   : > { %896 = vmatmul.msk.bf16.gmra.mxu0 %vm359_vm0, %v962_v5 }
  0x53   : > { %897 = vmatmul.msk.bf16.gmra.mxu0 %vm359_vm0, %v963_v6 }
  0x63   : > { %898 = vmatmul.msk.bf16.gmra.mxu0 %vm359_vm0, %v964_v8 }
  0x73   : > { %899 = vmatmul.msk.bf16.gmra.mxu0 %vm359_vm0, %v965_v12 }
  0x83   : > { %900 = vmatmul.msk.bf16.gmra.mxu0 %vm359_vm0, %v966_v17 }
  0x90   : > { %v393_v18 = vpop.f32.mrf.mxu0 }
  0x91   : > { %v394_v20 = vadd.f32 %v1117_v19, %v393_v18 }
  0x93   : > { %v449_v22 = vmul.f32 0.2, %v394_v20  ;;  %vm433_vm1 = vcmp.gt.f32.partialorder %v394_v20, 0.0 }
  0x95   : > { %v465_v25 = vsel %vm433_vm1, %v394_v20, %v449_v22  ;;  %v978_v22 = vld [vmem:[%s1209_s5 + $0x8] sm:$0xff] }
  0x98   : > { %v395_v21 = vpop.f32.mrf.mxu0 }
  0x99   : > { %v396_v23 = vadd.f32 %v1117_v19, %v395_v21  ;;  %v979_v21 = vld [vmem:[%s1209_s5 + $0x10] sm:$0xff] }
  0x9a   : > { %728 = vmatpush.bf16.msra.mxu2 %v979_v21  ;;  %990 = vmatpush.bf16.msrb.mxu3 %v979_v21 }
  0x9b   : > { %v450_v24 = vmul.f32 0.2, %v396_v23  ;;  %vm434_vm2 = vcmp.gt.f32.partialorder %v396_v23, 0.0 }
  0x9d   : > { %v466_v26 = vsel %vm434_vm2, %v396_v23, %v450_v24 }
  0x9e   : > { %v481_v27 = vpack.c.bf16 %v466_v26, %v465_v25  ;;  %729 = vmatpush.bf16.msra.mxu2 %v978_v22  ;;  %991 = vmatpush.bf16.msrb.mxu3 %v978_v22  ;;  %v977_v25 = vld [vmem:[%s1209_s5] sm:$0xff] }
  0xa0   : > { %v398_v28 = vpop.f32.mrf.mxu0  ;;  %565 = vmatmul.bf16.vlgmr.msra.gmra.mxu1 %v481_v27 }
  0xa1   : > { %v399_v29 = vadd.f32 %v1117_v19, %v398_v28 }
  0xa2   : > { %730 = vmatpush.bf16.msra.mxu2 %v977_v25  ;;  %992 = vmatpush.bf16.msrb.mxu3 %v977_v25 }
  0xa3   : > { %v451_v31 = vmul.f32 0.2, %v399_v29  ;;  %vm435_vm3 = vcmp.gt.f32.partialorder %v399_v29, 0.0 }
  0xa5   : > { %v467_v34 = vsel %vm435_vm3, %v399_v29, %v451_v31  ;;  %vm698_vm3 = vcmask 523264  }
  0xa8   : > { %v400_v30 = vpop.f32.mrf.mxu0 }
  0xa9   : > { %v401_v32 = vadd.f32 %v1117_v19, %v400_v30 }
  0xab   : > { %v452_v33 = vmul.f32 0.2, %v401_v32  ;;  %vm436_vm4 = vcmp.gt.f32.partialorder %v401_v32, 0.0 }
  0xad   : > { %v468_v35 = vsel %vm436_vm4, %v401_v32, %v452_v33  ;;  %v1150_v33 = vld [vmem:[%s1208_s4] ss:$0 sm:$0xff] }
  0xae   : > { %v482_v36 = vpack.c.bf16 %v468_v35, %v467_v34 }
  0xb0   : > { %v403_v37 = vpop.f32.mrf.mxu0  ;;  %570 = vmatmul.bf16.gmra.mxu1 %v482_v36 }
  0xb1   : > { %v404_v38 = vadd.f32 %v1117_v19, %v403_v37 }
  0xb3   : > { %v453_v40 = vmul.f32 0.2, %v404_v38  ;;  %vm437_vm5 = vcmp.gt.f32.partialorder %v404_v38, 0.0 }
  0xb5   : > { %v469_v43 = vsel %vm437_vm5, %v404_v38, %v453_v40 }
  0xb8   : > { %v405_v39 = vpop.f32.mrf.mxu0 }
  0xb9   : > { %v406_v41 = vadd.f32 %v1117_v19, %v405_v39 }
  0xbb   : > { %v454_v42 = vmul.f32 0.2, %v406_v41  ;;  %vm438_vm6 = vcmp.gt.f32.partialorder %v406_v41, 0.0 }
  0xbd   : > { %v470_v44 = vsel %vm438_vm6, %v406_v41, %v454_v42 }
  0xbe   : > { %v483_v45 = vpack.c.bf16 %v470_v44, %v469_v43 }
  0xc0   : > { %v408_v46 = vpop.f32.mrf.mxu0  ;;  %575 = vmatmul.bf16.gmra.mxu1 %v483_v45 }
  0xc1   : > { %v409_v47 = vadd.f32 %v1117_v19, %v408_v46 }
  0xc3   : > { %v455_v49 = vmul.f32 0.2, %v409_v47  ;;  %vm439_vm7 = vcmp.gt.f32.partialorder %v409_v47, 0.0 }
  0xc5   : > { %v471_v52 = vsel %vm439_vm7, %v409_v47, %v455_v49 }
  0xc8   : > { %v410_v48 = vpop.f32.mrf.mxu0 }
  0xc9   : > { %v411_v50 = vadd.f32 %v1117_v19, %v410_v48 }
  0xcb   : > { %v456_v51 = vmul.f32 0.2, %v411_v50  ;;  %vm440_vm8 = vcmp.gt.f32.partialorder %v411_v50, 0.0 }
  0xcd   : > { %v472_v53 = vsel %vm440_vm8, %v411_v50, %v456_v51 }
  0xce   : > { %v484_v54 = vpack.c.bf16 %v472_v53, %v471_v52 }
  0xd0   : > { %v413_v55 = vpop.f32.mrf.mxu0  ;;  %580 = vmatmul.bf16.gmra.mxu1 %v484_v54 }
  0xd1   : > { %v414_v56 = vadd.f32 %v1117_v19, %v413_v55 }
  0xd3   : > { %v457_v58 = vmul.f32 0.2, %v414_v56  ;;  %vm441_vm9 = vcmp.gt.f32.partialorder %v414_v56, 0.0 }
  0xd5   : > { %v473_v61 = vsel %vm441_vm9, %v414_v56, %v457_v58 }
  0xd8   : > { %v415_v57 = vpop.f32.mrf.mxu0 }
  0xd9   : > { %v416_v59 = vadd.f32 %v1117_v19, %v415_v57 }
  0xdb   : > { %v458_v60 = vmul.f32 0.2, %v416_v59  ;;  %vm442_vm10 = vcmp.gt.f32.partialorder %v416_v59, 0.0 }
  0xdd   : > { %v474_v62 = vsel %vm442_vm10, %v416_v59, %v458_v60 }
  0xde   : > { %v485_v63 = vpack.c.bf16 %v474_v62, %v473_v61 }
  0xe0   : > { %v418_v0 = vpop.f32.mrf.mxu0  ;;  %585 = vmatmul.bf16.gmra.mxu1 %v485_v63 }
  0xe1   : > { %v419_v1 = vadd.f32 %v1117_v19, %v418_v0 }
  0xe3   : > { %v459_v3 = vmul.f32 0.2, %v419_v1  ;;  %vm443_vm11 = vcmp.gt.f32.partialorder %v419_v1, 0.0 }
  0xe5   : > { %v475_v6 = vsel %vm443_vm11, %v419_v1, %v459_v3 }
  0xe8   : > { %v420_v2 = vpop.f32.mrf.mxu0 }
  0xe9   : > { %v421_v4 = vadd.f32 %v1117_v19, %v420_v2 }
  0xeb   : > { %v460_v5 = vmul.f32 0.2, %v421_v4  ;;  %vm444_vm12 = vcmp.gt.f32.partialorder %v421_v4, 0.0 }
  0xed   : > { %v476_v7 = vsel %vm444_vm12, %v421_v4, %v460_v5 }
  0xee   : > { %v486_v8 = vpack.c.bf16 %v476_v7, %v475_v6 }
  0xf0   : > { %v423_v9 = vpop.f32.mrf.mxu0  ;;  %590 = vmatmul.bf16.gmra.mxu1 %v486_v8 }
  0xf1   : > { %v424_v10 = vadd.f32 %v1117_v19, %v423_v9 }
  0xf3   : > { %v461_v12 = vmul.f32 0.2, %v424_v10  ;;  %vm445_vm13 = vcmp.gt.f32.partialorder %v424_v10, 0.0 }
  0xf5   : > { %v477_v16 = vsel %vm445_vm13, %v424_v10, %v461_v12 }
  0xf8   : > { %v425_v11 = vpop.f32.mrf.mxu0 }
  0xf9   : > { %v426_v13 = vadd.f32 %v1117_v19, %v425_v11 }
  0xfb   : > { %v462_v14 = vmul.f32 0.2, %v426_v13  ;;  %vm446_vm14 = vcmp.gt.f32.partialorder %v426_v13, 0.0 }
  0xfd   : > { %v478_v17 = vsel %vm446_vm14, %v426_v13, %v462_v14 }
  0xfe   : > { %v487_v18 = vpack.c.bf16 %v478_v17, %v477_v16 }
 0x100   : > { %v428_v20 = vpop.f32.mrf.mxu0  ;;  %595 = vmatmul.bf16.vlgmr.msra.gmra.mxu3 %v487_v18 }
 0x101   : > { %v429_v23 = vadd.f32 %v1117_v19, %v428_v20 }
 0x103   : > { %v463_v26 = vmul.f32 0.2, %v429_v23  ;;  %vm447_vm15 = vcmp.gt.f32.partialorder %v429_v23, 0.0 }
 0x105   : > { %v479_v29 = vsel %vm447_vm15, %v429_v23, %v463_v26 }
 0x108   : > { %v430_v24 = vpop.f32.mrf.mxu0 }
 0x109   : > { %v431_v27 = vadd.f32 %v1117_v19, %v430_v24 }
 0x10b   : > { %v464_v28 = vmul.f32 0.2, %v431_v27  ;;  %vm448_vm0 = vcmp.gt.f32.partialorder %v431_v27, 0.0 }
 0x10d   : > { %v480_v30 = vsel %vm448_vm0, %v431_v27, %v464_v28 }
 0x10e   : > { %v488_v31 = vpack.c.bf16 %v480_v30, %v479_v29 }
 0x110   : > { %600 = vmatmul.bf16.gmra.mxu3 %v488_v31 }
 0x11d   : > { %v566_v32 = vpop.f32.mrf.mxu1 }
 0x11e   : > { %v567_v34 = vadd.f32 %v1150_v33, %v566_v32 }
 0x120   : > { %v622_v36 = vmul.f32 0.2, %v567_v34  ;;  %vm606_vm1 = vcmp.gt.f32.partialorder %v567_v34, 0.0 }
 0x122   : > { %v638_v38 = vsel %vm606_vm1, %v567_v34, %v622_v36 }
 0x125   : > { %v568_v35 = vpop.f32.mrf.mxu1 }
 0x126   : > { %v569_v19 = vadd.f32 %v1150_v33, %v568_v35 }
 0x128   : > { %vm607_vm2 = vcmp.gt.f32.partialorder %v569_v19, 0.0  ;;  %v623_v37 = vmul.f32 0.2, %v569_v19 }
 0x12a   : > { %v639_v39 = vsel %vm607_vm2, %v569_v19, %v623_v37 }
 0x12b   : > { %v654_v40 = vpack.c.bf16 %v639_v39, %v638_v38 }
 0x12d   : > { %v571_v41 = vpop.f32.mrf.mxu1  ;;  %949 = vmatmul.msk.bf16.vlgmr.msra.gmra.mxu2 %vm698_vm3, %v654_v40 }
 0x12e   : > { %v572_v42 = vadd.f32 %v1150_v33, %v571_v41  ;;  %v1003_v41 = vld [vmem:[%s1210_s6] ss:$0 sm:$0xff] }
 0x130   : > { %v624_v44 = vmul.f32 0.2, %v572_v42  ;;  %vm608_vm4 = vcmp.gt.f32.partialorder %v572_v42, 0.0 }
 0x132   : > { %v640_v47 = vsel %vm608_vm4, %v572_v42, %v624_v44 }
 0x135   : > { %v573_v43 = vpop.f32.mrf.mxu1 }
 0x136   : > { %v574_v45 = vadd.f32 %v1150_v33, %v573_v43 }
 0x138   : > { %vm609_vm5 = vcmp.gt.f32.partialorder %v574_v45, 0.0  ;;  %v625_v46 = vmul.f32 0.2, %v574_v45 }
 0x13a   : > { %v641_v48 = vsel %vm609_vm5, %v574_v45, %v625_v46 }
 0x13b   : > { %v655_v49 = vpack.c.bf16 %v641_v48, %v640_v47 }
 0x13d   : > { %v576_v50 = vpop.f32.mrf.mxu1  ;;  %950 = vmatmul.msk.bf16.gmra.mxu2 %vm698_vm3, %v655_v49 }
 0x13e   : > { %v577_v51 = vadd.f32 %v1150_v33, %v576_v50 }
 0x140   : > { %v626_v53 = vmul.f32 0.2, %v577_v51  ;;  %vm610_vm6 = vcmp.gt.f32.partialorder %v577_v51, 0.0 }
 0x142   : > { %v642_v56 = vsel %vm610_vm6, %v577_v51, %v626_v53 }
 0x145   : > { %v578_v52 = vpop.f32.mrf.mxu1 }
 0x146   : > { %v579_v54 = vadd.f32 %v1150_v33, %v578_v52 }
 0x148   : > { %vm611_vm7 = vcmp.gt.f32.partialorder %v579_v54, 0.0  ;;  %v627_v55 = vmul.f32 0.2, %v579_v54 }
 0x14a   : > { %v643_v57 = vsel %vm611_vm7, %v579_v54, %v627_v55 }
 0x14b   : > { %v656_v58 = vpack.c.bf16 %v643_v57, %v642_v56 }
 0x14d   : > { %v581_v59 = vpop.f32.mrf.mxu1  ;;  %951 = vmatmul.msk.bf16.gmra.mxu2 %vm698_vm3, %v656_v58 }
 0x14e   : > { %v582_v60 = vadd.f32 %v1150_v33, %v581_v59 }
 0x150   : > { %v628_v62 = vmul.f32 0.2, %v582_v60  ;;  %vm612_vm8 = vcmp.gt.f32.partialorder %v582_v60, 0.0 }
 0x152   : > { %v644_v1 = vsel %vm612_vm8, %v582_v60, %v628_v62 }
 0x155   : > { %v583_v61 = vpop.f32.mrf.mxu1 }
 0x156   : > { %v584_v63 = vadd.f32 %v1150_v33, %v583_v61 }
 0x158   : > { %vm613_vm9 = vcmp.gt.f32.partialorder %v584_v63, 0.0  ;;  %v629_v0 = vmul.f32 0.2, %v584_v63 }
 0x15a   : > { %v645_v2 = vsel %vm613_vm9, %v584_v63, %v629_v0 }
 0x15b   : > { %v657_v3 = vpack.c.bf16 %v645_v2, %v644_v1 }
 0x15d   : > { %v586_v4 = vpop.f32.mrf.mxu1  ;;  %952 = vmatmul.msk.bf16.gmra.mxu2 %vm698_vm3, %v657_v3 }
 0x15e   : > { %v587_v5 = vadd.f32 %v1150_v33, %v586_v4 }
 0x160   : > { %v630_v7 = vmul.f32 0.2, %v587_v5  ;;  %vm614_vm10 = vcmp.gt.f32.partialorder %v587_v5, 0.0 }
 0x162   : > { %v646_v10 = vsel %vm614_vm10, %v587_v5, %v630_v7 }
 0x165   : > { %v588_v6 = vpop.f32.mrf.mxu1 }
 0x166   : > { %v589_v8 = vadd.f32 %v1150_v33, %v588_v6 }
 0x168   : > { %vm615_vm11 = vcmp.gt.f32.partialorder %v589_v8, 0.0  ;;  %v631_v9 = vmul.f32 0.2, %v589_v8 }
 0x16a   : > { %v647_v11 = vsel %vm615_vm11, %v589_v8, %v631_v9 }
 0x16b   : > { %v658_v12 = vpack.c.bf16 %v647_v11, %v646_v10 }
 0x16d   : > { %v591_v13 = vpop.f32.mrf.mxu1  ;;  %953 = vmatmul.msk.bf16.gmra.mxu2 %vm698_vm3, %v658_v12 }
 0x16e   : > { %v592_v14 = vadd.f32 %v1150_v33, %v591_v13 }
 0x170   : > { %v632_v16 = vmul.f32 0.2, %v592_v14  ;;  %vm616_vm12 = vcmp.gt.f32.partialorder %v592_v14, 0.0 }
 0x172   : > { %v648_v20 = vsel %vm616_vm12, %v592_v14, %v632_v16 }
 0x175   : > { %v593_v15 = vpop.f32.mrf.mxu1 }
 0x176   : > { %v594_v17 = vadd.f32 %v1150_v33, %v593_v15 }
 0x178   : > { %vm617_vm13 = vcmp.gt.f32.partialorder %v594_v17, 0.0  ;;  %v633_v18 = vmul.f32 0.2, %v594_v17 }
 0x17a   : > { %v649_v21 = vsel %vm617_vm13, %v594_v17, %v633_v18 }
 0x17b   : > { %v659_v22 = vpack.c.bf16 %v649_v21, %v648_v20 }
 0x17d   : > { %954 = vmatmul.msk.bf16.gmra.mxu2 %vm698_vm3, %v659_v22 }
 0x183   : > { %v596_v23 = vpop.f32.mrf.mxu3 }
 0x184   : > { %v597_v24 = vadd.f32 %v1150_v33, %v596_v23 }
 0x186   : > { %v634_v26 = vmul.f32 0.2, %v597_v24  ;;  %vm618_vm14 = vcmp.gt.f32.partialorder %v597_v24, 0.0 }
 0x188   : > { %v650_v29 = vsel %vm618_vm14, %v597_v24, %v634_v26 }
 0x18b   : > { %v598_v25 = vpop.f32.mrf.mxu3 }
 0x18c   : > { %v599_v27 = vadd.f32 %v1150_v33, %v598_v25 }
 0x18e   : > { %vm619_vm15 = vcmp.gt.f32.partialorder %v599_v27, 0.0  ;;  %v635_v28 = vmul.f32 0.2, %v599_v27 }
 0x190   : > { %v651_v30 = vsel %vm619_vm15, %v599_v27, %v635_v28 }
 0x191   : > { %v660_v31 = vpack.c.bf16 %v651_v30, %v650_v29 }
 0x193   : > { %v601_v32 = vpop.f32.mrf.mxu3  ;;  %955 = vmatmul.msk.bf16.gmra.mxu2 %vm698_vm3, %v660_v31 }
 0x194   : > { %v602_v34 = vadd.f32 %v1150_v33, %v601_v32 }
 0x196   : > { %v636_v36 = vmul.f32 0.2, %v602_v34  ;;  %vm620_vm0 = vcmp.gt.f32.partialorder %v602_v34, 0.0 }
 0x198   : > { %v652_v38 = vsel %vm620_vm0, %v602_v34, %v636_v36 }
 0x19b   : > { %v603_v35 = vpop.f32.mrf.mxu3 }
 0x19c   : > { %v604_v19 = vadd.f32 %v1150_v33, %v603_v35 }
 0x19e   : > { %vm621_vm1 = vcmp.gt.f32.partialorder %v604_v19, 0.0  ;;  %v637_v37 = vmul.f32 0.2, %v604_v19 }
 0x1a0   : > { %v653_v39 = vsel %vm621_vm1, %v604_v19, %v637_v37 }
 0x1a1   : > { %v661_v40 = vpack.c.bf16 %v653_v39, %v652_v38 }
 0x1a3   : > { %956 = vmatmul.msk.bf16.vlgmr.msrb.gmra.mxu3 %vm698_vm3, %v661_v40 }
 0x1b0   : > { %v732_v33 = vpop.f32.mrf.mxu2 }
 0x1b1   : > { %v733_v42 = vadd.f32 %v1003_v41, %v732_v33 }
 0x1b3   : > { %772 = vst [vmem:[%s1183_s25] sm:$0xff] %v733_v42 }
 0x1b8   : > { %v734_v43 = vpop.f32.mrf.mxu2 }
 0x1b9   : > { %v735_v44 = vadd.f32 %v1003_v41, %v734_v43 }
 0x1bb   : > { %773 = vst [vmem:[%s1183_s25 + $0x8] sm:$0xff] %v735_v44 }
 0x1c0   : > { %v737_v45 = vpop.f32.mrf.mxu2 }
 0x1c1   : > { %v738_v46 = vadd.f32 %v1003_v41, %v737_v45 }
 0x1c3   : > { %774 = vst [vmem:[%s1183_s25 + $0x10] sm:$0xff] %v738_v46 }
 0x1c8   : > { %v739_v47 = vpop.f32.mrf.mxu2 }
 0x1c9   : > { %v740_v48 = vadd.f32 %v1003_v41, %v739_v47 }
 0x1cb   : > { %775 = vst [vmem:[%s1183_s25 + $0x18] sm:$0xff] %v740_v48 }
 0x1d0   : > { %v742_v49 = vpop.f32.mrf.mxu2 }
 0x1d1   : > { %v743_v50 = vadd.f32 %v1003_v41, %v742_v49 }
 0x1d3   : > { %776 = vst [vmem:[%s1183_s25 + $0x20] sm:$0xff] %v743_v50 }
 0x1d8   : > { %v744_v51 = vpop.f32.mrf.mxu2 }
 0x1d9   : > { %v745_v52 = vadd.f32 %v1003_v41, %v744_v51 }
 0x1db   : > { %777 = vst [vmem:[%s1183_s25 + $0x28] sm:$0xff] %v745_v52 }
 0x1e0   : > { %v747_v53 = vpop.f32.mrf.mxu2 }
 0x1e1   : > { %v748_v54 = vadd.f32 %v1003_v41, %v747_v53 }
 0x1e3   : > { %778 = vst [vmem:[%s1183_s25 + $0x30] sm:$0xff] %v748_v54 }
 0x1e8   : > { %v749_v55 = vpop.f32.mrf.mxu2 }
 0x1e9   : > { %v750_v56 = vadd.f32 %v1003_v41, %v749_v55 }
 0x1eb   : > { %779 = vst [vmem:[%s1183_s25 + $0x38] sm:$0xff] %v750_v56 }
 0x1f0   : > { %v752_v57 = vpop.f32.mrf.mxu2 }
 0x1f1   : > { %v753_v58 = vadd.f32 %v1003_v41, %v752_v57 }
 0x1f3   : > { %780 = vst [vmem:[%s1183_s25 + $0x40] sm:$0xff] %v753_v58 }
 0x1f8   : > { %v754_v59 = vpop.f32.mrf.mxu2 }
 0x1f9   : > { %v755_v60 = vadd.f32 %v1003_v41, %v754_v59 }
 0x1fb   : > { %781 = vst [vmem:[%s1183_s25 + $0x48] sm:$0xff] %v755_v60 }
 0x200   : > { %v757_v61 = vpop.f32.mrf.mxu2 }
 0x201   : > { %v758_v62 = vadd.f32 %v1003_v41, %v757_v61 }
 0x203   : > { %782 = vst [vmem:[%s1183_s25 + $0x50] sm:$0xff] %v758_v62 }
 0x208   : > { %v759_v63 = vpop.f32.mrf.mxu2 }
 0x209   : > { %v760_v0 = vadd.f32 %v1003_v41, %v759_v63 }
 0x20b   : > { %783 = vst [vmem:[%s1183_s25 + $0x58] sm:$0xff] %v760_v0 }
 0x216   : > { %v762_v1 = vpop.f32.mrf.mxu2 }
 0x217   : > { %v763_v2 = vadd.f32 %v1003_v41, %v762_v1 }
 0x219   : > { %784 = vst [vmem:[%s1183_s25 + $0x60] sm:$0xff] %v763_v2 }
 0x21e   : > { %v764_v3 = vpop.f32.mrf.mxu2 }
 0x21f   : > { %v765_v4 = vadd.f32 %v1003_v41, %v764_v3 }
 0x221   : > { %785 = vst [vmem:[%s1183_s25 + $0x68] sm:$0xff] %v765_v4 }
 0x226   : > { %v767_v5 = vpop.f32.mrf.mxu3 }
 0x227   : > { %v768_v6 = vadd.f32 %v1003_v41, %v767_v5 }
 0x229   : > { %786 = vst [vmem:[%s1183_s25 + $0x70] sm:$0xff] %v768_v6 }
 0x22e   : > { %v769_v7 = vpop.f32.mrf.mxu3 }
 0x22f   : > { %v770_v8 = vadd.f32 %v1003_v41, %v769_v7 }
 0x231   : > { %787 = vst [vmem:[%s1183_s25 + $0x78] sm:$0xff] %v770_v8 }
 0x232 PF: > { %s17_s24 = sadd.s32 1, %s1010_s24  }
 0x233   : > { %p14_p4 = scmp.ge.s32.totalorder %s17_s24, 4  }
 0x235   :  { %16 = sbr.rel (!%p14_p4) target bundleno = 1 (0x1), region = 78 }

</bundles_post_ra>
